<compile_context>
chip_gen: v6e
topology: v6e:2x2x1
jax: 0.10.0
libtpu: 0.0.40
codegen_flags: <defaults>
</compile_context>

<pallas_src>
import jax
import jax.numpy as jnp
from jax.experimental import pallas as pl
from jax.experimental.pallas import tpu as pltpu

LANE = 128
SUBLANE = 8
MAX_MEL_BLOCK_ROWS = 2048  # (2048,128) f32 = 1 MiB/buffer; 2 streams x 2 dbl-buffers = 4 MiB


def _round_up(x: int, m: int) -> int:
    return ((x + m - 1) // m) * m


def _mel_2d_view(x):
    """Zero-copy 2-D streaming view of a mel tensor (avoids the jnp.pad full HBM copy).

    Prefers a lane-dense (N//128, 128) reshape (free for a contiguous array); otherwise
    keeps the original trailing dim, which Mosaic allows as a full-extent last block dim.
    """
    n = int(x.size)
    if n % LANE == 0:
        return x.reshape(n // LANE, LANE)
    if x.ndim >= 2:
        return x.reshape(-1, x.shape[-1])
    # 1-D, non-128-multiple fallback (not expected for mels): tiny pad, one copy.
    flat = jnp.pad(x.reshape(-1), (0, LANE - n % LANE))
    return flat.reshape(-1, LANE)


def _small_slab(x, rows: int):
    """Tiny duration/pitch/energy tensor -> zero-padded (rows, 128) f32 slab."""
    flat = x.reshape(-1).astype(jnp.float32)
    flat = jnp.pad(flat, (0, rows * LANE - flat.shape[0]))
    return flat.reshape(rows, LANE)


def _make_mel_partial_kernel(block_rows: int, rows_total: int, cols: int):
    ragged = (rows_total % block_rows) != 0

    def kernel(mel_ref, pmel_ref, part_ref):
        d = pmel_ref[...].astype(jnp.float32) - mel_ref[...].astype(jnp.float32)
        dd = d * d
        if ragged:
            # Mask rows of the (possibly) ragged last tile; select (not multiply) so any
            # stale VMEM garbage (incl. NaN/Inf) in the un-DMAed region cannot propagate.
            valid = rows_total - pl.program_id(0) * block_rows
            row_id = jax.lax.broadcasted_iota(jnp.int32, (block_rows, cols), 0)
            dd = jnp.where(row_id < valid, dd, 0.0)
        part_ref[...] = jnp.sum(dd, axis=0, keepdims=True).reshape(1, 1, cols)

    return kernel


def _make_finalize_kernel(inv_mel: float, comp_weights):
    def kernel(part_ref, tgt_ref, pred_ref, out_ref):
        mel_loss = jnp.sum(part_ref[...]) * inv_mel
        small = jnp.float32(0.0)
        for c, w in enumerate(comp_weights):
            # Same form as the reference: MSE(log(p+1), log(t+1)).
            # Zero-padded tails give log(1) - log(1) = 0 so they contribute nothing.
            ld = (jnp.log(pred_ref[c].astype(jnp.float32) + 1.0)
                  - jnp.log(tgt_ref[c].astype(jnp.float32) + 1.0))
            small = small + jnp.sum(ld * ld) * w
        out_ref[0, 0] = mel_loss + small

    return kernel


def fastspeech2_loss(mel_target, duration, pitch, energy,
                     pred_mel, pred_duration, pred_pitch, pred_energy,
                     duration_scale: float = 1.0,
                     pitch_scale: float = 1.0,
                     energy_scale: float = 1.0):
    """Pallas implementation of FastSpeech2Loss.forward. Returns a scalar f32."""
    assert mel_target.shape == pred_mel.shape
    assert duration.shape == pred_duration.shape
    assert pitch.shape == pred_pitch.shape
    assert energy.shape == pred_energy.shape

    mel_count = int(mel_target.size)

    # ---- Stage 1: per-tile mel squared-error partial sums (HBM-bound, parallel grid) ----
    mel_v = _mel_2d_view(mel_target)
    pmel_v = _mel_2d_view(pred_mel)
    rows_total, cols = mel_v.shape
    block_rows = rows_total if rows_total <= MAX_MEL_BLOCK_ROWS else MAX_MEL_BLOCK_ROWS
    num_tiles = -(-rows_total // block_rows)

    elem_bytes = int(jnp.dtype(mel_v.dtype).itemsize)
    cost1 = pl.CostEstimate(
        flops=int(3 * mel_count),
        transcendentals=0,
        bytes_accessed=int(2 * mel_count * elem_bytes + num_tiles * cols * 4))

    partials = pl.pallas_call(
        _make_mel_partial_kernel(block_rows, rows_total, cols),
        out_shape=jax.ShapeDtypeStruct((num_tiles, 1, cols), jnp.float32),
        grid=(num_tiles,),
        in_specs=[pl.BlockSpec((block_rows, cols), lambda i: (i, 0)),
                  pl.BlockSpec((block_rows, cols), lambda i: (i, 0))],
        out_specs=pl.BlockSpec((1, 1, cols), lambda i: (i, 0, 0)),
        compiler_params=pltpu.CompilerParams(
            dimension_semantics=("parallel",)),   # lets v7x split the stream over both TCs
        cost_estimate=cost1,
    )(mel_v, pmel_v)

    # ---- Stage 2: combine partials + duration/pitch/energy MSLE (tiny) ----
    smalls_t = (duration, pitch, energy)
    smalls_p = (pred_duration, pred_pitch, pred_energy)
    scales = (float(duration_scale), float(pitch_scale), float(energy_scale))

    rows_s = max(_round_up(max(1, -(-int(x.size) // LANE)), SUBLANE) for x in smalls_t)
    tgt_slab = jnp.stack([_small_slab(x, rows_s) for x in smalls_t])
    pred_slab = jnp.stack([_small_slab(x, rows_s) for x in smalls_p])
    # Per-component weight: scale_c / (3 * true_count_c) — each MSLE uses its own count.
    comp_weights = tuple(s / (3.0 * float(t.size)) for s, t in zip(scales, smalls_t))

    out = pl.pallas_call(
        _make_finalize_kernel(1.0 / float(mel_count), comp_weights),
        out_shape=jax.ShapeDtypeStruct((1, 1), jnp.float32),
        grid=(1,),
        in_specs=[pl.BlockSpec((num_tiles, 1, cols), lambda i: (0, 0, 0)),
                  pl.BlockSpec((3, rows_s, LANE), lambda i: (0, 0, 0)),
                  pl.BlockSpec((3, rows_s, LANE), lambda i: (0, 0, 0))],
        out_specs=pl.BlockSpec((1, 1), lambda i: (0, 0),
                               memory_space=pltpu.MemorySpace.SMEM),
        compiler_params=pltpu.CompilerParams(dimension_semantics=("arbitrary",)),
        cost_estimate=pl.CostEstimate(
            flops=int(4 * 3 * rows_s * LANE + num_tiles * cols),
            transcendentals=int(2 * 3 * rows_s * LANE),
            bytes_accessed=int(partials.nbytes + tgt_slab.nbytes + pred_slab.nbytes + 4)),
    )(partials, tgt_slab, pred_slab)

    # TODO(synk): if N % 128 != 0 and the trailing mel dim is very narrow, DMA granularity
    # drops; a scalar-prefetched flat-offset variant could keep lane density without a copy.
    return out[0, 0]


def _reference(mel_target, duration, pitch, energy,
               pred_mel, pred_duration, pred_pitch, pred_energy,
               duration_scale=1.0, pitch_scale=1.0, energy_scale=1.0):
    mse = lambda a, b: jnp.mean((a - b) ** 2)
    msle = lambda p, t: mse(jnp.log(p + 1.0), jnp.log(t + 1.0))
    return mse(pred_mel, mel_target) + (
        duration_scale * msle(pred_duration, duration)
        + pitch_scale * msle(pred_pitch, pitch)
        + energy_scale * msle(pred_energy, energy)
    ) / 3.0


if __name__ == "__main__":
    key = jax.random.PRNGKey(0)
    B, T, n_mels = 2, 8, 32

    k = jax.random.split(key, 8)
    mel_target = jax.random.normal(k[0], (B, T, n_mels), dtype=jnp.float32)
    pred_mel = jax.random.normal(k[1], (B, T, n_mels), dtype=jnp.float32)
    # duration / pitch / energy must satisfy x + 1 > 0 for log; use positive uniforms.
    duration = jax.random.uniform(k[2], (B, T), minval=0.0, maxval=5.0, dtype=jnp.float32)
    pred_duration = jax.random.uniform(k[3], (B, T), minval=0.0, maxval=5.0, dtype=jnp.float32)
    pitch = jax.random.uniform(k[4], (B, T), minval=0.0, maxval=2.0, dtype=jnp.float32)
    pred_pitch = jax.random.uniform(k[5], (B, T), minval=0.0, maxval=2.0, dtype=jnp.float32)
    energy = jax.random.uniform(k[6], (B, T), minval=0.0, maxval=3.0, dtype=jnp.float32)
    pred_energy = jax.random.uniform(k[7], (B, T), minval=0.0, maxval=3.0, dtype=jnp.float32)

    loss = fastspeech2_loss(mel_target, duration, pitch, energy,
                            pred_mel, pred_duration, pred_pitch, pred_energy,
                            duration_scale=1.0, pitch_scale=1.0, energy_scale=1.0)
    loss = jax.block_until_ready(loss)

    ref = _reference(mel_target, duration, pitch, energy,
                     pred_mel, pred_duration, pred_pitch, pred_energy)
    assert jnp.allclose(loss, ref, rtol=1e-5, atol=1e-6), (loss, ref)

    print("KERNEL_OK")
</pallas_src>

<mosaic_0001>
module attributes {stable_mosaic.version = 11 : i64} {
  func.func @kernel(%arg0: i32, %arg1: memref<4x128xf32, #tpu.memory_space<vmem>>, %arg2: memref<4x128xf32, #tpu.memory_space<vmem>>, %arg3: memref<1x1x128xf32, #tpu.memory_space<vmem>>) attributes {dimension_semantics = [#tpu.dimension_semantics<parallel>], iteration_bounds = array<i64: 1>, scalar_prefetch = 0 : i64, scratch_operands = 0 : i64, tpu.core_type = #tpu.core_type<tc>, window_params = [{transform_indices = @transform_0, window_bounds = array<i64: 4, 128>}, {transform_indices = @transform_1, window_bounds = array<i64: 4, 128>}, {transform_indices = @transform_2, window_bounds = array<i64: 1, 1, 128>}]} {
    %c0 = arith.constant 0 : index
    %c0_0 = arith.constant 0 : index
    %0 = vector.load %arg2[%c0, %c0_0] : memref<4x128xf32, #tpu.memory_space<vmem>>, vector<4x128xf32>
    %c0_1 = arith.constant 0 : index
    %c0_2 = arith.constant 0 : index
    %1 = vector.load %arg1[%c0_1, %c0_2] : memref<4x128xf32, #tpu.memory_space<vmem>>, vector<4x128xf32>
    %2 = arith.subf %0, %1 : vector<4x128xf32>
    %3 = arith.mulf %2, %2 : vector<4x128xf32>
    %cst = arith.constant dense<0.000000e+00> : vector<128xf32>
    %4 = vector.multi_reduction <add>, %3, %cst [0] : vector<4x128xf32> to vector<128xf32>
    %5 = vector.shape_cast %4 : vector<128xf32> to vector<1x128xf32>
    %6 = vector.shape_cast %5 : vector<1x128xf32> to vector<1x1x128xf32>
    %c0_3 = arith.constant 0 : index
    %c0_4 = arith.constant 0 : index
    %c0_5 = arith.constant 0 : index
    %7 = vector.load %arg3[%c0_3, %c0_4, %c0_5] : memref<1x1x128xf32, #tpu.memory_space<vmem>>, vector<1x1x128xf32>
    tpu.vector_store %arg3[%c0_3, %c0_4, %c0_5], %6 {strides = array<i32>} : memref<1x1x128xf32, #tpu.memory_space<vmem>>, vector<1x1x128xf32>,
    return
  }
  func.func @transform_0(%arg0: i32) -> (i32, i32) {
    %c0_i32 = arith.constant 0 : i32
    %c0_i32_0 = arith.constant 0 : i32
    return %arg0, %c0_i32 : i32, i32
  }
  func.func @transform_1(%arg0: i32) -> (i32, i32) {
    %c0_i32 = arith.constant 0 : i32
    %c0_i32_0 = arith.constant 0 : i32
    return %arg0, %c0_i32 : i32, i32
  }
  func.func @transform_2(%arg0: i32) -> (i32, i32, i32) {
    %c0_i32 = arith.constant 0 : i32
    %c0_i32_0 = arith.constant 0 : i32
    %c0_i32_1 = arith.constant 0 : i32
    return %arg0, %c0_i32, %c0_i32_0 : i32, i32, i32
  }
}

</mosaic_0001>

<bundles_post_ra>
// kernel: tpu_custom_call.1
= control target key start
LH: loop header
LB: loop body
LE: loop exit
PB: predicated region body
PF: predicated region fallthrough
CT: control target
= control target key end

     0   :  { %7 = vsyncpa [#allocation3], 0  ;;  %s161_s0 = inlined_call_operand.hbm [shape: f32[4,128], index: 0, kind: input, shape index: {}]   ;;  %s162_s1 = inlined_call_operand.hbm [shape: f32[4,128], index: 1, kind: input, shape index: {}]   ;;  %s163_s2 = inlined_call_operand.hbm [shape: f32[1,1,128], index: 2, kind: output, shape index: {}]  }
   0x1   :  { %8 = vsyncpa [#allocation6], 0 }
   0x2   :  { %9 = vsyncpa [#allocation4], 0  ;;  %s134_s9 = smov [#allocation2]   ;;  %s135_s11 = smov [#allocation5]  }
   0x3   :  { %s16_s10 = sshll.u32 %s134_s9, 4  ;;  %s26_s12 = sshll.u32 %s135_s11, 4  ;;  %s17_s10 = int_to_ptr.vmem [resolvable:$true] %s16_s10  ;;  %s27_s12 = int_to_ptr.vmem [resolvable:$true] %s26_s12 }
   0x4   :  { %s76_s13 = scalar_lea.vmem %s17_s10, 64  ;;  %p81_p1 = scmp.lt.s32.totalorder %s17_s10, %s17_s10 }
   0x5   :  { %p77_p0 = scmp.ne.s32.totalorder %s17_s10, %s76_s13  ;;  %p82_p2 = scmp.lt.s32.totalorder %s76_s13, %s76_s13 }
   0x7   :  { %p83_p3 = por %p82_p2, %p81_p1 }
   0x9   :  { %p84_p4 = pnand %p83_p3, %p77_p0 }
   0xb   :  { %87 = shalt.err (!%p84_p4)
}
   0xc   :  { %19 = dma.hbm_to_vmem [thread:$0]  %s161_s0, 64, %s17_s10, [#allocation3]  }
   0xd   :  { %s96_s16 = scalar_lea.vmem %s27_s12, 64  ;;  %p101_p6 = scmp.lt.s32.totalorder %s27_s12, %s27_s12 }
   0xe   :  { %p97_p5 = scmp.ne.s32.totalorder %s27_s12, %s96_s16  ;;  %p102_p7 = scmp.lt.s32.totalorder %s96_s16, %s96_s16 }
  0x10   :  { %p103_p8 = por %p102_p7, %p101_p6 }
  0x12   :  { %p104_p9 = pnand %p103_p8, %p97_p5 }
  0x14   :  { %107 = shalt.err (!%p104_p9)
}
  0x15   :  { %29 = dma.hbm_to_vmem [thread:$0]  %s162_s1, 64, %s27_s12, [#allocation6]  }
  0x16   :  { %128 = dma.done.wait [#allocation3], 64  }
  0x17   :  { %129 = vsyncadd [#allocation3], 4294967232 }
  0x18   :  { %130 = dma.done.wait [#allocation6], 64  }
  0x19   :  { %131 = vsyncadd [#allocation6], 4294967232  ;;  %v36_v0 = vld [vmem:[#allocation5] sm:$0xf]  ;;  %v37_v1 = vld [vmem:[#allocation2] sm:$0xf] }
  0x1a   :  { %v38_v2 = vsub.f32 %v36_v0, %v37_v1  ;;  %vm40_vm0 = vcmask 1043456   ;;  %s136_s0 = smov [#allocation7]  }
  0x1b   :  { %s55_s19 = sshll.u32 %s136_s0, 4  ;;  %s56_s19 = int_to_ptr.vmem [resolvable:$true] %s55_s19 }
  0x1c   :  { %v39_v3 = vmul.f32 %v38_v2, %v38_v2  ;;  %s108_s1 = scalar_lea.vmem %s56_s19, 16  ;;  %s112_s20 = scalar_lea.vmem %s56_s19, 32 }
  0x1d   :  { %p109_p10 = scmp.ne.s32.totalorder %s56_s19, %s108_s1  ;;  %p113_p11 = scmp.lt.s32.totalorder %s56_s19, %s56_s19 }
  0x1e   :  { %v41_v4 = vsel %vm40_vm0, %v39_v3, 0.0  ;;  %p114_p12 = scmp.lt.s32.totalorder %s112_s20, %s108_s1 }
  0x1f   :  { %v42_v5 = vrot.slane %v41_v4, 4 }
  0x20   :  { %p115_p13 = por %p114_p12, %p113_p11 }
  0x21   :  { %v43_v6 = vadd.f32 %v42_v5, %v41_v4 }
  0x22   :  { %p116_p0 = pnand %p115_p13, %p109_p10 }
  0x23   :  { %v44_v7 = vrot.slane %v43_v6, 2 }
  0x25   :  { %v45_v8 = vadd.f32 %v44_v7, %v43_v6 }
  0x27   :  { %v46_v9 = vrot.slane %v45_v8, 1 }
  0x29   :  { %v47_v10 = vadd.f32 %v46_v9, %v45_v8 }
  0x2b   :  { %48 = vst [vmem:[#allocation7] sm:$0x1] %v47_v10 }
  0x2c   :  { %119 = shalt.err (!%p116_p0)
}
  0x2d   :  { %58 = dma.vmem_to_hbm [thread:$0]  %s56_s19, 16, %s163_s2, [#allocation4]  }
  0x2e   :  { %132 = dma.done.wait [#allocation4], 16  }
  0x2f   :  { %133 = vsyncadd [#allocation4], 4294967280 }
  0x30   :  { %62 = vsyncpa [#allocation3], 1 }
  0x31   :  { %63 = vsyncpa [#allocation6], 1 }
  0x32   :  { %64 = vsyncpa [#allocation4], 1 }

</bundles_post_ra>
